<compile_context>
chip_gen: v5e
topology: v5e:2x2
jax: 0.10.0
libtpu: 0.0.40
codegen_flags: <defaults>
</compile_context>

<pallas_src>
import math
import functools

import jax
import jax.numpy as jnp
from jax import lax
from jax.experimental import pallas as pl
from jax.experimental.pallas import tpu as pltpu


def make_positional_encoding(d_model: int, max_len: int = 5000) -> jnp.ndarray:
    """Deterministic sinusoidal PE buffer, identical to the PyTorch __init__."""
    position = jnp.arange(max_len, dtype=jnp.float32)[:, None]                 # [max_len, 1]
    div_term = jnp.exp(
        jnp.arange(0, d_model, 2, dtype=jnp.float32) * (-math.log(10000.0) / d_model)
    )                                                                          # [d_model/2]
    pe = jnp.zeros((max_len, 1, d_model), dtype=jnp.float32)
    pe = pe.at[:, 0, 0::2].set(jnp.sin(position * div_term))
    pe = pe.at[:, 0, 1::2].set(jnp.cos(position * div_term))
    return pe


# ----------------------------------------------------------------------------- kernels
def _add_pe_kernel(x_ref, pe_ref, o_ref):
    # x_ref: (ts, B, D)   pe_ref: (ts, 1, D)   o_ref: (ts, B, D)
    o_ref[...] = (x_ref[...].astype(jnp.float32) + pe_ref[...]).astype(o_ref.dtype)


def _add_pe_dropout_kernel(x_ref, pe_ref, rnd_ref, o_ref, *, threshold_i32: int, scale: float):
    # rnd_ref holds signed-remapped uniform random int32 bits; keep iff rnd >= threshold,
    # which is exactly P(keep) = 1 - dropout_p.  Single compare + select + mul.
    y = x_ref[...].astype(jnp.float32) + pe_ref[...]
    keep = rnd_ref[...] >= jnp.int32(threshold_i32)
    y = y * jnp.where(keep, jnp.float32(scale), jnp.float32(0.0))
    o_ref[...] = y.astype(o_ref.dtype)


# ----------------------------------------------------------------------------- wrapper
def _choose_seq_tile(S: int, bytes_per_row: int, vmem_budget_bytes: int) -> int:
    """Largest sequence tile whose double-buffered blocks fit the VMEM budget."""
    ts = max(1, vmem_budget_bytes // max(1, 2 * bytes_per_row))   # x2: double buffering
    ts = min(ts, S)
    if S >= 2:
        # Keep at least 2 grid steps so the "parallel" axis can shard across the
        # 2 TensorCores of a v7x chip (and pipelining has something to overlap).
        ts = min(ts, pl.cdiv(S, 2))
    if ts > 8:
        ts = (ts // 8) * 8
    return int(max(1, ts))


def positional_encoding_forward(
    x: jnp.ndarray,
    pe: jnp.ndarray,
    *,
    dropout_p: float = 0.2,
    training: bool = False,
    key: jax.Array | None = None,
    block_seq: int | None = None,
    vmem_block_budget_bytes: int = 24 << 20,   # fits v7x 32 MiB scoped default w/ headroom
    donate_x: bool = False,
) -> jnp.ndarray:
    """x: [S, B, D]; pe: [max_len, 1, D]. Returns dropout(x + pe[:S]) (inverted dropout)."""
    S, B, D = x.shape
    pe_s = pe[:S]                                   # glue: slice the buffer to seq_len
    itemsize = jnp.dtype(x.dtype).itemsize
    apply_dropout = bool(training) and dropout_p > 0.0

    if apply_dropout and dropout_p >= 1.0:
        return jnp.zeros_like(x)

    # VMEM footprint per sequence row of one block: x-in + out (+ random bits) + pe row.
    bytes_per_row = 2 * B * D * itemsize + D * 4
    if apply_dropout:
        bytes_per_row += B * D * 4

    ts = block_seq if block_seq is not None else _choose_seq_tile(S, bytes_per_row, vmem_block_budget_bytes)
    ts = int(max(1, min(ts, S)))
    grid = (pl.cdiv(S, ts),)

    est_vmem = 2 * ts * bytes_per_row               # double-buffered pipeline footprint
    vmem_limit = int(min(max(est_vmem + (4 << 20), 16 << 20), 48 << 20))  # < v7x 64 MiB

    compiler_params = pltpu.CompilerParams(
        dimension_semantics=("parallel",),
        vmem_limit_bytes=vmem_limit,
    )

    x_spec = pl.BlockSpec((ts, B, D), lambda i: (i, 0, 0))
    pe_spec = pl.BlockSpec((ts, 1, D), lambda i: (i, 0, 0))
    out_spec = pl.BlockSpec((ts, B, D), lambda i: (i, 0, 0))
    out_shape = jax.ShapeDtypeStruct((S, B, D), x.dtype)
    io_alias = {0: 0} if donate_x else {}

    if not apply_dropout:
        # TODO(synk): in pure eval mode this add could also be left to XLA fusion with
        # the neighbouring op; kept as a Pallas kernel per the exercise requirements.
        return pl.pallas_call(
            _add_pe_kernel,
            out_shape=out_shape,
            grid=grid,
            in_specs=[x_spec, pe_spec],
            out_specs=out_spec,
            compiler_params=compiler_params,
            input_output_aliases=io_alias,
        )(x, pe_s)

    # --- training path: dropout mask from a JAX PRNG key -------------------------------
    # TODO(synk): on real TPU HW the on-chip PRNG (pltpu.prng_seed/prng_random_bits) would
    # avoid this extra HBM stream, but those primitives have no interpret/CPU lowering.
    if key is None:
        key = jax.random.PRNGKey(0)
    bits_u32 = jax.random.bits(key, (S, B, D), dtype=jnp.uint32)
    # Remap to int32 (x ^ 0x80000000 bitcast) so the in-kernel compare is a plain signed
    # i32 compare:  u >= T  <=>  (u ^ 0x80000000)_i32 >= T - 2^31.
    rnd_i32 = lax.bitcast_convert_type(bits_u32 ^ jnp.uint32(0x80000000), jnp.int32)
    threshold_u32 = min(int(round(dropout_p * 2.0 ** 32)), 2 ** 32 - 1)
    threshold_i32 = threshold_u32 - 2 ** 31
    scale = 1.0 / (1.0 - dropout_p)

    kernel = functools.partial(_add_pe_dropout_kernel, threshold_i32=threshold_i32, scale=scale)
    rnd_spec = pl.BlockSpec((ts, B, D), lambda i: (i, 0, 0))

    return pl.pallas_call(
        kernel,
        out_shape=out_shape,
        grid=grid,
        in_specs=[x_spec, pe_spec, rnd_spec],
        out_specs=out_spec,
        compiler_params=compiler_params,
        input_output_aliases=io_alias,
    )(x, pe_s, rnd_i32)


# ----------------------------------------------------------------------------- demo / checks
if __name__ == "__main__":
    # Small shapes consistent with the module's forward: [seq_len, batch, d_model]
    seq_len, batch, d_model = 8, 2, 32
    max_len = 64

    key = jax.random.PRNGKey(0)
    x = jax.random.normal(key, (seq_len, batch, d_model), dtype=jnp.float32)
    pe = make_positional_encoding(d_model, max_len)

    # Eval-mode forward (dropout is identity), matching module.eval() semantics.
    out = positional_encoding_forward(x, pe, dropout_p=0.2, training=False)
    out = jax.block_until_ready(out)

    ref = x + pe[:seq_len]
    assert out.shape == (seq_len, batch, d_model)
    assert jnp.allclose(out, ref, atol=1e-6, rtol=1e-6)

    # Training path: deterministic given the key; reproduce the mask in pure JAX.
    drop_key = jax.random.PRNGKey(123)
    p = 0.2
    out_train = positional_encoding_forward(x, pe, dropout_p=p, training=True, key=drop_key)
    out_train = jax.block_until_ready(out_train)

    bits_ref = jax.random.bits(drop_key, (seq_len, batch, d_model), dtype=jnp.uint32)
    thr = jnp.uint32(min(int(round(p * 2.0 ** 32)), 2 ** 32 - 1))
    keep_ref = bits_ref >= thr
    ref_train = (x + pe[:seq_len]) * jnp.where(keep_ref, jnp.float32(1.0 / (1.0 - p)), 0.0)
    assert out_train.shape == (seq_len, batch, d_model)
    assert jnp.allclose(out_train, ref_train, atol=1e-6, rtol=1e-6)

    print("KERNEL_OK")
</pallas_src>

<mosaic_0001>
module attributes {stable_mosaic.version = 11 : i64} {
  func.func @_add_pe_kernel(%arg0: i32, %arg1: memref<4x2x32xf32, #tpu.memory_space<vmem>>, %arg2: memref<4x1x32xf32, #tpu.memory_space<vmem>>, %arg3: memref<4x2x32xf32, #tpu.memory_space<vmem>>) attributes {dimension_semantics = [#tpu.dimension_semantics<parallel>], iteration_bounds = array<i64: 2>, scalar_prefetch = 0 : i64, scratch_operands = 0 : i64, tpu.core_type = #tpu.core_type<tc>, window_params = [{transform_indices = @transform_0, window_bounds = array<i64: 4, 2, 32>}, {transform_indices = @transform_1, window_bounds = array<i64: 4, 1, 32>}, {transform_indices = @transform_2, window_bounds = array<i64: 4, 2, 32>}]} {
    %c0 = arith.constant 0 : index
    %c0_0 = arith.constant 0 : index
    %c0_1 = arith.constant 0 : index
    %0 = vector.load %arg1[%c0, %c0_0, %c0_1] : memref<4x2x32xf32, #tpu.memory_space<vmem>>, vector<4x2x32xf32>
    %c0_2 = arith.constant 0 : index
    %c0_3 = arith.constant 0 : index
    %c0_4 = arith.constant 0 : index
    %1 = vector.load %arg2[%c0_2, %c0_3, %c0_4] : memref<4x1x32xf32, #tpu.memory_space<vmem>>, vector<4x1x32xf32>
    %2 = vector.broadcast %1 : vector<4x1x32xf32> to vector<4x2x32xf32>
    %3 = arith.addf %0, %2 : vector<4x2x32xf32>
    %c0_5 = arith.constant 0 : index
    %c0_6 = arith.constant 0 : index
    %c0_7 = arith.constant 0 : index
    %4 = vector.load %arg3[%c0_5, %c0_6, %c0_7] : memref<4x2x32xf32, #tpu.memory_space<vmem>>, vector<4x2x32xf32>
    tpu.vector_store %arg3[%c0_5, %c0_6, %c0_7], %3 {strides = array<i32>} : memref<4x2x32xf32, #tpu.memory_space<vmem>>, vector<4x2x32xf32>,
    return
  }
  func.func @transform_0(%arg0: i32) -> (i32, i32, i32) {
    %c0_i32 = arith.constant 0 : i32
    %c0_i32_0 = arith.constant 0 : i32
    %c0_i32_1 = arith.constant 0 : i32
    return %arg0, %c0_i32, %c0_i32_0 : i32, i32, i32
  }
  func.func @transform_1(%arg0: i32) -> (i32, i32, i32) {
    %c0_i32 = arith.constant 0 : i32
    %c0_i32_0 = arith.constant 0 : i32
    %c0_i32_1 = arith.constant 0 : i32
    return %arg0, %c0_i32, %c0_i32_0 : i32, i32, i32
  }
  func.func @transform_2(%arg0: i32) -> (i32, i32, i32) {
    %c0_i32 = arith.constant 0 : i32
    %c0_i32_0 = arith.constant 0 : i32
    %c0_i32_1 = arith.constant 0 : i32
    return %arg0, %c0_i32, %c0_i32_0 : i32, i32, i32
  }
}

</mosaic_0001>

<bundles_post_ra>
// kernel: tpu_custom_call.1
= control target key start
LH: loop header
LB: loop body
LE: loop exit
PB: predicated region body
PF: predicated region fallthrough
CT: control target
= control target key end

     0   :  { %7 = vsyncpa [#allocation3], 0  ;;  %s749_s0 = inlined_call_operand.hbm [shape: f32[8,2,32], index: 0, kind: input, shape index: {}]   ;;  %s750_s1 = inlined_call_operand.hbm [shape: f32[8,1,32], index: 1, kind: input, shape index: {}]   ;;  %s751_s2 = inlined_call_operand.hbm [shape: f32[8,2,32], index: 2, kind: output, shape index: {}]  }
   0x1   :  { %9 = vsyncpa [#allocation3 + $0x1], 0 }
   0x2   :  { %10 = vsyncpa [#allocation6], 0 }
   0x3   :  { %12 = vsyncpa [#allocation6 + $0x1], 0 }
   0x4   :  { %13 = vsyncpa [#allocation4], 0 }
   0x5   :  { %15 = vsyncpa [#allocation4 + $0x1], 0  ;;  %s582_s9 = smov 0   ;;  %s584_s10 = smov 0  }
   0x6   :  { %s586_s11 = smov 0   ;;  %s588_s12 = smov 0  }
   0x7 LB: > { %s603_s13 = sadd.s32 4294967295, %s559_s12   ;;  %s349_s14 = sadd.s32 4294967294, %s559_s12   ;;  %s559_s12 = sphi %s588_s12, %s762_s12   ;;  %s555_s11 = sphi %s586_s11, %s761_s11   ;;  %s551_s10 = sphi %s584_s10, %s760_s10   ;;  %s547_s9 = sphi %s582_s9, %s759_s9  }
   0x8   : > { %s607_s15 = sadd.s32 1, %s559_s12   ;;  %s28_s16 = sadd.s32 1, %s555_s11 }
   0x9   : > { %s25_s17 = ssub.s32 %s559_s12, %s607_s15  ;;  %p35_p0 = scmp.ne.s32.totalorder %s555_s11, %s551_s10 }
   0xa   : > { %p26_p1 = scmp.eq.s32.totalorder %s25_s17, 0  ;;  %p36_p2 = scmp.eq.s32.totalorder %s559_s12, 0 }
   0xb   : > { %p41_p3 = scmp.ne.s32.totalorder %s551_s10, %s547_s9  ;;  %p42_p4 = scmp.eq.s32.totalorder %s603_s13, 0 }
   0xc   : > { %s619_s18 = scalar_select %p26_p1, %s555_s11, %s28_s16  }
   0xd   : > { %p621_p5 = por %p36_p2, %p35_p0  ;;  %p625_p6 = por %p42_p4, %p41_p3 }
   0xe   : > { %p91_p7 = scmp.eq.s32.totalorder %s603_s13, 1  ;;  %p97_p8 = scmp.eq.s32.totalorder %s349_s14, 1 }
   0xf   : > { %p385_p10 = scmp.lt.s32.totalorder %s559_s12, 2  ;;  %s641_s23 = sand.u32 1, %s555_s11  }
  0x10   : > { %p632_p11 = por %p91_p7, %p35_p0  ;;  %p636_p12 = por %p97_p8, %p41_p3 }
  0x11   : > { %s366_s24 = sshll.u32 %s559_s12, 3  ;;  %s352_s25 = sshll.u32 %s641_s23, 3 }
  0x12   : > { %s126_s28 = scalar_lea.hbm %s749_s0, %s366_s24  ;;  %s121_s30 = scalar_lea.vmem [#allocation2], %s352_s25 }
  0x13   : > { %s127_s29 = sshll.u32 %s126_s28, 4  ;;  %s129_s3 = sshll.u32 %s121_s30, 4  ;;  %s128_s29 = int_to_ptr.hbm [resolvable:$true] %s127_s29  ;;  %s130_s3 = int_to_ptr.vmem [resolvable:$true] %s129_s3 }
  0x14   : > { %p650_p13 = pnand %p385_p10, %p621_p5  ;;  %p357_p0 = scmp.ge.s32.totalorder %s559_s12, 1 }
  0x15   : > { %p158_p1 = scmp.lt.s32.totalorder %s559_s12, 3  ;;  %s118_s5 = scalar_lea.sflag [#allocation3], %s641_s23 }
  0x16   : > { %s429_s6 = sshra.s32 %s128_s29, 4  ;;  %p433_p3 = pneg %p650_p13  ;;  %s430_s6 = int_to_ptr.hbm [resolvable:$true] %s429_s6 }
  0x17   : > { %s431_s7 = scalar_lea.hbm %s430_s6, 8  ;;  %s436_s16 = scalar_lea.hbm %s749_s0, 16 }
  0x18   : > { %p432_p2 = scmp.ne.s32.totalorder %s430_s6, %s431_s7  ;;  %p437_p5 = scmp.lt.s32.totalorder %s430_s6, %s749_s0 }
  0x19   : > { %p438_p8 = scmp.lt.s32.totalorder %s436_s16, %s431_s7 }
  0x1a   : > { %p434_p4 = pnand %p433_p3, %p432_p2 }
  0x1b   : > { %p439_p10 = por %p438_p8, %p437_p5 }
  0x1c   : > { %p435_p7 = pneg %p434_p4 }
  0x1e   : > { %p440_p9 = pnand %p439_p10, %p435_p7 }
  0x20   : > { %443 = shalt.err (!%p440_p9)
}
  0x21   : > { %s561_s24 = smov 32   ;;  %s562_s25 = smov 2  }
  0x22   : > { %377 = dma.hbm_to_vmem [thread:$0]  (!%p650_p13), %s128_s29, 128, %s130_s3, %s118_s5, %s561_s24, %s561_s24, %s562_s25  }
  0x23   : > { %p674_p2 = pnand %p357_p0, %p158_p1  ;;  %s355_s27 = sshll.u32 %s641_s23, 2 }
  0x24   : > { %s356_s28 = sshll.u32 %s559_s12, 2  ;;  %s143_s14 = scalar_lea.vmem [#allocation5], %s355_s27 }
  0x25   : > { %s147_s7 = scalar_lea.hbm %s750_s1, %s356_s28  ;;  %s150_s16 = sshll.u32 %s143_s14, 4  ;;  %s151_s16 = int_to_ptr.vmem [resolvable:$true] %s150_s16 }
  0x26   : > { %s148_s8 = sshll.u32 %s147_s7, 4  ;;  %s140_s17 = scalar_lea.sflag [#allocation6], %s641_s23  ;;  %s149_s8 = int_to_ptr.hbm [resolvable:$true] %s148_s8 }
  0x27   : > { %s459_s19 = sshra.s32 %s149_s8, 4  ;;  %s466_s24 = scalar_lea.hbm %s750_s1, 8  ;;  %s460_s19 = int_to_ptr.hbm [resolvable:$true] %s459_s19 }
  0x28   : > { %s461_s29 = scalar_lea.hbm %s460_s19, 4  ;;  %p467_p4 = scmp.lt.s32.totalorder %s460_s19, %s750_s1 }
  0x29   : > { %p462_p9 = scmp.ne.s32.totalorder %s460_s19, %s461_s29  ;;  %p468_p7 = scmp.lt.s32.totalorder %s466_s24, %s461_s29 }
  0x2b   : > { %p464_p0 = pnand %p462_p9, %p433_p3  ;;  %p469_p5 = por %p468_p7, %p467_p4 }
  0x2d   : > { %p465_p1 = pneg %p464_p0 }
  0x2f   : > { %p470_p8 = pnand %p469_p5, %p465_p1 }
  0x31   : > { %473 = shalt.err (!%p470_p8)
}
  0x32   : > { %s563_s23 = smov 16   ;;  %s564_s27 = smov 1  }
  0x33   : > { %380 = dma.hbm_to_vmem [thread:$0]  (!%p650_p13), %s149_s8, 64, %s151_s16, %s140_s17, %s563_s23, %s563_s23, %s564_s27  }
  0x34   : > { %162 = sbr.rel (%p674_p2) target bundleno = 78 (0x4e), region = 28  ;;  %s698_s30 = sand.u32 (!%p674_p2), 1, %s551_s10  }
  0x35   : > { %s358_s6 = sshll.u32 (!%p674_p2), %s698_s30, 3  ;;  %s165_s7 = scalar_lea.sflag (!%p674_p2), [#allocation3], %s698_s30 }
  0x36   : > { %s168_s14 = scalar_lea.vmem (!%p674_p2), [#allocation2], %s358_s6 }
  0x39   : > { %534 = dma.done.wait (%p625_p6), %s165_s7, 128  }
  0x3a   : > { %536 = vsyncadd (%p625_p6), %s165_s7, 4294967168  ;;  %s359_s4 = sshll.u32 %s698_s30, 2  ;;  %s175_s26 = scalar_lea.sflag [#allocation6], %s698_s30 }
  0x3b   : > { %s178_s8 = scalar_lea.vmem [#allocation5], %s359_s4 }
  0x3c   : > { %538 = dma.done.wait (%p625_p6), %s175_s26, 64  }
  0x3d   : > { %540 = vsyncadd (%p625_p6), %s175_s26, 4294967232  ;;  %s367_s16 = sshll.u32 %s603_s13, 3  ;;  %vm232_vm0 = vcmask 254976   ;;  %s204_s3 = scalar_lea.vmem [#allocation7], %s358_s6  ;;  %v208_v0 = vld [vmem:[%s168_s14] sm:$0x3] }
  0x3e   : > { %s249_s29 = scalar_lea.hbm %s751_s2, %s367_s16  ;;  %s250_s5 = sshll.u32 %s204_s3, 4  ;;  %v425_v1 = vld [vmem:[%s178_s8] ss:$0 sm:$0xff]  ;;  %v209_v2 = vld [vmem:[%s168_s14 + $0x2] sm:$0x3]  ;;  %s251_s5 = int_to_ptr.vmem [resolvable:$true] %s250_s5 }
  0x3f   : > { %s252_s24 = sshll.u32 %s249_s29, 4  ;;  %v426_v3 = vld [vmem:[%s178_s8 + $0x1] ss:$0 sm:$0xff]  ;;  %v228_v4 = vadd.f32 %v425_v1, %v208_v0  ;;  %v210_v5 = vld [vmem:[%s168_s14 + $0x4] sm:$0x3]  ;;  %s238_s13 = scalar_lea.sflag [#allocation4], %s698_s30  ;;  %s253_s24 = int_to_ptr.hbm [resolvable:$true] %s252_s24 }
  0x40   : > { %v427_v6 = vld [vmem:[%s178_s8 + $0x2] ss:$0 sm:$0xff]  ;;  %v229_v7 = vadd.f32 %v426_v3, %v209_v2  ;;  %v211_v8 = vld [vmem:[%s168_s14 + $0x6] sm:$0x3]  ;;  %v428_v9 = vld [vmem:[%s178_s8 + $0x3] ss:$0 sm:$0xff] }
  0x41   : > { %233 = vst.msk [vmem:[%s204_s3] sm:$0x3] %vm232_vm0, %v228_v4  ;;  %v230_v10 = vadd.f32 %v427_v6, %v210_v5  ;;  %v231_v11 = vadd.f32 %v428_v9, %v211_v8  ;;  %s503_s20 = sshra.s32 %s253_s24, 4  ;;  %s509_s27 = scalar_lea.hbm %s751_s2, 16  ;;  %s504_s20 = int_to_ptr.hbm [resolvable:$true] %s503_s20 }
  0x42   : > { %234 = vst.msk [vmem:[%s204_s3 + $0x2] sm:$0x3] %vm232_vm0, %v229_v7  ;;  %s505_s25 = scalar_lea.hbm %s504_s20, 8  ;;  %p510_p10 = scmp.lt.s32.totalorder %s504_s20, %s751_s2 }
  0x43   : > { %235 = vst.msk [vmem:[%s204_s3 + $0x4] sm:$0x3] %vm232_vm0, %v230_v10  ;;  %p506_p6 = scmp.ne.s32.totalorder %s504_s20, %s505_s25  ;;  %p511_p2 = scmp.lt.s32.totalorder %s509_s27, %s505_s25 }
  0x44   : > { %236 = vst.msk [vmem:[%s204_s3 + $0x6] sm:$0x3] %vm232_vm0, %v231_v11 }
  0x45   : > { %p507_p13 = pnand %p506_p6, %p632_p11  ;;  %p512_p9 = por %p511_p2, %p510_p10 }
  0x47   : > { %p508_p3 = pneg %p507_p13 }
  0x49   : > { %p513_p0 = pnand %p512_p9, %p508_p3 }
  0x4b   : > { %516 = shalt.err (!%p513_p0)
}
  0x4c   : > { %s565_s30 = smov 32   ;;  %s566_s14 = smov 2  }
  0x4d   : > { %372 = dma.vmem_to_hbm [thread:$0]  (%p632_p11), %s251_s5, 128, %s253_s24, %s238_s13, %s565_s30, %s565_s30, %s566_s14  }
  0x4e PF: > { %s267_s4 = sand.u32 1, %s547_s9   ;;  %p758_p1 = scmp.ge.s32.totalorder %s559_s12, 2 }
  0x4f   : > { %s268_s26 = scalar_lea.sflag [#allocation4], %s267_s4 }
  0x50   : > { %p382_p4 = pnand %p758_p1, %p636_p12 }
  0x52   : > { %p383_p7 = pneg %p382_p4 }
  0x54   : > { %542 = dma.done.wait (%p383_p7), %s268_s26, 128  }
  0x55   : > { %544 = vsyncadd (%p383_p7), %s268_s26, 4294967168  ;;  %p18_p5 = scmp.ge.s32.totalorder %s607_s15, 4   ;;  %s759_s9 = smov %s551_s10 }
  0x56   : > { %s760_s10 = smov %s555_s11  ;;  %s761_s11 = smov %s619_s18 }
  0x57   : > { %s762_s12 = smov %s607_s15  ;;  %20 = sbr.rel (!%p18_p5) target bundleno = 7 (0x7), region = 86 }
  0x5c   :  { %274 = vsyncpa [#allocation3], 1 }
  0x5d   :  { %276 = vsyncpa [#allocation3 + $0x1], 1 }
  0x5e   :  { %277 = vsyncpa [#allocation6], 1 }
  0x5f   :  { %279 = vsyncpa [#allocation6 + $0x1], 1 }
  0x60   :  { %280 = vsyncpa [#allocation4], 1 }
  0x61   :  { %282 = vsyncpa [#allocation4 + $0x1], 1 }

</bundles_post_ra>
